<compile_context>
chip_gen: v7x
topology: tpu7x:2x2x1
jax: 0.10.0
libtpu: 0.0.40
codegen_flags: <defaults>
</compile_context>

<pallas_src>
import math
from functools import partial

import jax
import jax.numpy as jnp
from jax.experimental import pallas as pl
from jax.experimental.pallas import tpu as pltpu


def _round_up(x, m):
    return ((x + m - 1) // m) * m


# ----------------------------- Pallas point head -----------------------------

def _make_point_head_kernel(num_fc, d_pad, c_out_pad):
    n_layers = num_fc + 1

    def kernel(fine_ref, coarse_ref, wa_ref, wb_ref, b_ref, out_ref):
        # fine_ref:   (d_pad, TP)            bf16   points on lanes
        # coarse_ref: (ck_pad, TP)           bf16
        # wa_ref:     (n_layers, d_pad, d_pad)  bf16  (zero padded)
        # wb_ref:     (n_layers*d_pad, ck_pad)  bf16  (zero padded)
        # b_ref:      (n_layers*d_pad, 1)       f32
        coarse = coarse_ref[...]

        # All coarse-path matmuls + bias adds hoisted into one MXU pass.
        cb = jnp.dot(wb_ref[...], coarse,
                     preferred_element_type=jnp.float32) + b_ref[...]

        x = fine_ref[...]                                   # bf16
        for k in range(n_layers):
            h = jnp.dot(wa_ref[k], x, preferred_element_type=jnp.float32)
            h = h + cb[k * d_pad:(k + 1) * d_pad]           # f32 epilogue
            if k < num_fc:
                x = jnp.maximum(h, 0.0).astype(jnp.bfloat16)  # ReLU, back to bf16
            else:
                out_ref[...] = h[:c_out_pad].astype(out_ref.dtype)

    return kernel


def point_head_forward(fine_points, coarse_points, params, *, tile_p=512):
    """StandardPointHead forward (Conv1d kernel=1 == matmul) via Pallas.

    fine_points:   (N, nin, P) float32
    coarse_points: (N, C,   P) float32
    params: list of (Wa, Wb, b) per layer; Wa:(out,in_x) Wb:(out,C) b:(out,1)
    returns (N, C, P) float32
    """
    N, nin, P = fine_points.shape
    C = coarse_points.shape[1]
    num_fc = len(params) - 1
    n_layers = num_fc + 1
    fc_dim = params[0][0].shape[0]

    d_pad = _round_up(max(nin, fc_dim, C), 8)   # unified activation channel pad
    ck_pad = _round_up(C, 8)                    # coarse (contraction) channel pad
    c_out_pad = _round_up(C, 8)                 # predictor output row pad

    # ---- fold batch into the point (lane) axis and pad -----------------------
    NP = N * P
    tile_p = max(128, (int(tile_p) // 128) * 128)
    # clamp tile so we keep >=2 grid steps when there is enough work (megacore)
    tile_p = min(tile_p, max(128, _round_up(-(-NP // 2), 128)))
    NP_pad = _round_up(NP, tile_p)

    fine2 = jnp.transpose(fine_points, (1, 0, 2)).reshape(nin, NP)
    coarse2 = jnp.transpose(coarse_points, (1, 0, 2)).reshape(C, NP)
    fine2 = jnp.pad(fine2.astype(jnp.bfloat16),
                    ((0, d_pad - nin), (0, NP_pad - NP)))
    coarse2 = jnp.pad(coarse2.astype(jnp.bfloat16),
                      ((0, ck_pad - C), (0, NP_pad - NP)))

    # ---- pack weights into padded slabs (bf16 MXU inputs, f32 bias) ----------
    wa_pack = jnp.zeros((n_layers, d_pad, d_pad), jnp.float32)
    wb_pack = jnp.zeros((n_layers * d_pad, ck_pad), jnp.float32)
    b_pack = jnp.zeros((n_layers * d_pad, 1), jnp.float32)
    for k, (wa, wb, b) in enumerate(params):
        o, i = wa.shape
        wa_pack = wa_pack.at[k, :o, :i].set(wa)
        wb_pack = wb_pack.at[k * d_pad:k * d_pad + o, :C].set(wb)
        b_pack = b_pack.at[k * d_pad:k * d_pad + o, :].set(b)
    wa_pack = wa_pack.astype(jnp.bfloat16)
    wb_pack = wb_pack.astype(jnp.bfloat16)

    grid = (NP_pad // tile_p,)

    # explicit, conservative VMEM budget (double-buffered tiles + resident weights)
    tile_vmem = 2 * tile_p * (2 * d_pad + 2 * ck_pad + 4 * c_out_pad)
    w_vmem = n_layers * d_pad * (2 * d_pad + 2 * ck_pad + 4 * 128)
    vmem_limit = int(min(32 * 2 ** 20, max(4 * 2 ** 20, 4 * (tile_vmem + w_vmem))))

    out = pl.pallas_call(
        _make_point_head_kernel(num_fc, d_pad, c_out_pad),
        out_shape=jax.ShapeDtypeStruct((c_out_pad, NP_pad), jnp.float32),
        grid_spec=pltpu.PrefetchScalarGridSpec(
            num_scalar_prefetch=0,
            grid=grid,
            in_specs=[
                pl.BlockSpec((d_pad, tile_p), lambda p: (0, p)),
                pl.BlockSpec((ck_pad, tile_p), lambda p: (0, p)),
                pl.BlockSpec((n_layers, d_pad, d_pad), lambda p: (0, 0, 0)),
                pl.BlockSpec((n_layers * d_pad, ck_pad), lambda p: (0, 0)),
                pl.BlockSpec((n_layers * d_pad, 1), lambda p: (0, 0)),
            ],
            out_specs=pl.BlockSpec((c_out_pad, tile_p), lambda p: (0, p)),
        ),
        compiler_params=pltpu.CompilerParams(
            dimension_semantics=("parallel",),
            vmem_limit_bytes=vmem_limit),
    )(fine2, coarse2, wa_pack, wb_pack, b_pack)

    out = out[:C, :NP].reshape(C, N, P)
    return jnp.transpose(out, (1, 0, 2))


# ------------------------------ JAX glue ops ---------------------------------

def calculate_uncertainty(logits):
    """(N, C, ...) -> (N, 1, ...) uncertainty = top2 - top1 (or -|x| if C==1)."""
    if logits.shape[1] == 1:
        return -jnp.abs(logits)
    s = jnp.sort(logits, axis=1)          # ascending
    unc = s[:, -2] - s[:, -1]
    return unc[:, None]


def get_uncertain_point_coords_on_grid(unc_map, num_points):
    N, _, H, W = unc_map.shape
    num_points = min(H * W, num_points)
    flat = unc_map.reshape(N, H * W)
    _, idx = jax.lax.top_k(flat, num_points)          # (N, P) int32
    w_step = 1.0 / float(W)
    h_step = 1.0 / float(H)
    x = 0.5 * w_step + w_step * (idx % W).astype(jnp.float32)
    y = 0.5 * h_step + h_step * (idx // W).astype(jnp.float32)
    coords = jnp.stack([x, y], axis=-1)                # (N, P, 2), [:,:,0]=x
    return idx, coords


def point_sample(features, coords):
    """grid_sample(features, 2*coords-1, bilinear, align_corners=False, zeros pad)."""
    N, C, H, W = features.shape
    x = coords[..., 0] * W - 0.5       # (N, P) pixel coords
    y = coords[..., 1] * H - 0.5
    x0 = jnp.floor(x)
    y0 = jnp.floor(y)
    x1 = x0 + 1.0
    y1 = y0 + 1.0
    wx1 = x - x0
    wx0 = 1.0 - wx1
    wy1 = y - y0
    wy0 = 1.0 - wy1
    flat = features.reshape(N, C, H * W)

    def gather(ix, iy):
        valid = (ix >= 0) & (ix <= W - 1) & (iy >= 0) & (iy <= H - 1)
        ixc = jnp.clip(ix, 0, W - 1).astype(jnp.int32)
        iyc = jnp.clip(iy, 0, H - 1).astype(jnp.int32)
        lin = iyc * W + ixc                                     # (N, P)
        g = jnp.take_along_axis(flat, lin[:, None, :], axis=2)  # (N, C, P)
        return g * valid[:, None, :].astype(features.dtype)

    out = (gather(x0, y0) * (wx0 * wy0)[:, None, :]
           + gather(x1, y0) * (wx1 * wy0)[:, None, :]
           + gather(x0, y1) * (wx0 * wy1)[:, None, :]
           + gather(x1, y1) * (wx1 * wy1)[:, None, :])
    return out


def bilinear_upsample2x(x):
    """F.interpolate(scale_factor=2, mode='bilinear', align_corners=False)."""
    N, C, H, W = x.shape
    Ho, Wo = 2 * H, 2 * W

    def src_idx(n_out):
        s = (jnp.arange(n_out, dtype=jnp.float32) + 0.5) * 0.5 - 0.5
        return jnp.maximum(s, 0.0)

    ys = src_idx(Ho)
    xs = src_idx(Wo)
    y0 = jnp.floor(ys).astype(jnp.int32)
    x0 = jnp.floor(xs).astype(jnp.int32)
    y1 = jnp.minimum(y0 + 1, H - 1)
    x1 = jnp.minimum(x0 + 1, W - 1)
    wy = (ys - y0.astype(jnp.float32))[None, None, :, None]
    wx = (xs - x0.astype(jnp.float32))[None, None, None, :]

    rows = x[:, :, y0, :] * (1.0 - wy) + x[:, :, y1, :] * wy        # (N,C,Ho,W)
    out = rows[:, :, :, x0] * (1.0 - wx) + rows[:, :, :, x1] * wx   # (N,C,Ho,Wo)
    return out


# --------------------------- parameters & forward -----------------------------

def init_point_head_params(key, nin, num_classes, fc_dim, num_fc):
    """Deterministic synthetic init mirroring StandardPointHead.__init__."""
    params = []
    fc_dim_in = nin + num_classes
    for _ in range(num_fc):
        key, wk = jax.random.split(key)
        std = math.sqrt(2.0 / fc_dim)            # kaiming_normal_ fan_out, relu
        w = std * jax.random.normal(wk, (fc_dim, fc_dim_in), dtype=jnp.float32)
        b = jnp.zeros((fc_dim, 1), dtype=jnp.float32)
        wa = w[:, : fc_dim_in - num_classes]     # part acting on x
        wb = w[:, fc_dim_in - num_classes:]      # part acting on coarse
        params.append((wa, wb, b))
        fc_dim_in = fc_dim + num_classes         # coarse_pred_each_layer=True
    key, wk = jax.random.split(key)
    w = 0.001 * jax.random.normal(wk, (num_classes, fc_dim_in), dtype=jnp.float32)
    b = jnp.zeros((num_classes, 1), dtype=jnp.float32)
    params.append((w[:, : fc_dim_in - num_classes],
                   w[:, fc_dim_in - num_classes:], b))
    return params


@partial(jax.jit, static_argnums=(3, 4))
def point_rend_sem_seg_head_eval(coarse_sem_seg_logits, features, params,
                                 subdivision_steps, subdivision_num_points):
    """Eval-mode forward of PointRendSemSegHead."""
    sem_seg_logits = coarse_sem_seg_logits
    for _ in range(subdivision_steps):
        sem_seg_logits = bilinear_upsample2x(sem_seg_logits)
        uncertainty_map = calculate_uncertainty(sem_seg_logits)
        point_indices, point_coords = get_uncertain_point_coords_on_grid(
            uncertainty_map, subdivision_num_points)

        coarse_points = point_sample(coarse_sem_seg_logits, point_coords)
        fine_points = point_sample(features, point_coords)

        point_logits = point_head_forward(fine_points, coarse_points, params)

        N, C, H, W = sem_seg_logits.shape
        P = point_indices.shape[1]
        flat = sem_seg_logits.reshape(N * C, H * W)
        idx = jnp.broadcast_to(point_indices[:, None, :], (N, C, P)).reshape(N * C, P)
        vals = point_logits.reshape(N * C, P)
        flat = jax.vmap(lambda f, i, v: f.at[i].set(v))(flat, idx, vals)
        sem_seg_logits = flat.reshape(N, C, H, W)
    return {"sem_seg_logits": sem_seg_logits}


if __name__ == "__main__":
    key = jax.random.PRNGKey(0)
    N, num_classes, nin = 2, 4, 32
    Hc = Wc = 16              # coarse logit grid
    Hf = Wf = 32              # fine feature grid
    num_fc = 3
    subdivision_steps = 2
    subdivision_num_points = 128

    k1, k2, k3 = jax.random.split(key, 3)
    coarse_logits = jax.random.normal(k1, (N, num_classes, Hc, Wc), dtype=jnp.float32)
    features = jax.random.normal(k2, (N, nin, Hf, Wf), dtype=jnp.float32)
    params = init_point_head_params(k3, nin, num_classes, fc_dim=nin, num_fc=num_fc)

    out = point_rend_sem_seg_head_eval(
        coarse_logits, features, params, subdivision_steps, subdivision_num_points)
    sem_seg = jax.block_until_ready(out["sem_seg_logits"])
    assert sem_seg.shape == (N, num_classes, Hc * 4, Wc * 4)
    assert sem_seg.dtype == jnp.float32
    print("KERNEL_OK")
</pallas_src>

<mosaic_0001>
module attributes {stable_mosaic.version = 11 : i64} {
  func.func @kernel(%arg0: i32, %arg1: memref<32x128xbf16, #tpu.memory_space<vmem>>, %arg2: memref<8x128xbf16, #tpu.memory_space<vmem>>, %arg3: memref<4x32x32xbf16, #tpu.memory_space<vmem>>, %arg4: memref<128x8xbf16, #tpu.memory_space<vmem>>, %arg5: memref<128x1xf32, #tpu.memory_space<vmem>>, %arg6: memref<8x128xf32, #tpu.memory_space<vmem>>) attributes {dimension_semantics = [#tpu.dimension_semantics<parallel>], iteration_bounds = array<i64: 2>, scalar_prefetch = 0 : i64, scratch_operands = 0 : i64, tpu.core_type = #tpu.core_type<tc>, window_params = [{transform_indices = @transform_0, window_bounds = array<i64: 32, 128>}, {transform_indices = @transform_1, window_bounds = array<i64: 8, 128>}, {pipeline_mode = #tpu.pipeline_mode<synchronous>, transform_indices = @transform_2, window_bounds = array<i64: 4, 32, 32>}, {pipeline_mode = #tpu.pipeline_mode<synchronous>, transform_indices = @transform_3, window_bounds = array<i64: 128, 8>}, {pipeline_mode = #tpu.pipeline_mode<synchronous>, transform_indices = @transform_4, window_bounds = array<i64: 128, 1>}, {transform_indices = @transform_5, window_bounds = array<i64: 8, 128>}]} {
    %c0 = arith.constant 0 : index
    %c0_0 = arith.constant 0 : index
    %0 = vector.load %arg2[%c0, %c0_0] : memref<8x128xbf16, #tpu.memory_space<vmem>>, vector<8x128xbf16>
    %c0_1 = arith.constant 0 : index
    %c0_2 = arith.constant 0 : index
    %1 = vector.load %arg4[%c0_1, %c0_2] : memref<128x8xbf16, #tpu.memory_space<vmem>>, vector<128x8xbf16>
    %cst = arith.constant dense<0.000000e+00> : vector<128x128xf32>
    %2 = tpu.matmul %1, %0, %cst {dimension_numbers = #tpu.dot_dimension_numbers<[1], [0], [0], [1], [0, 0, 1, 1], [], []>} : vector<128x8xbf16>, vector<8x128xbf16>, vector<128x128xf32> -> vector<128x128xf32>
    %c0_3 = arith.constant 0 : index
    %c0_4 = arith.constant 0 : index
    %3 = vector.load %arg5[%c0_3, %c0_4] : memref<128x1xf32, #tpu.memory_space<vmem>>, vector<128x1xf32>
    %4 = vector.broadcast %3 : vector<128x1xf32> to vector<128x128xf32>
    %5 = arith.addf %2, %4 : vector<128x128xf32>
    %c0_5 = arith.constant 0 : index
    %c0_6 = arith.constant 0 : index
    %6 = vector.load %arg1[%c0_5, %c0_6] : memref<32x128xbf16, #tpu.memory_space<vmem>>, vector<32x128xbf16>
    %c0_7 = arith.constant 0 : index
    %c0_8 = arith.constant 0 : index
    %c0_9 = arith.constant 0 : index
    %7 = vector.load %arg3[%c0_7, %c0_8, %c0_9] : memref<4x32x32xbf16, #tpu.memory_space<vmem>>, vector<1x32x32xbf16>
    %8 = vector.shape_cast %7 : vector<1x32x32xbf16> to vector<32x32xbf16>
    %cst_10 = arith.constant dense<0.000000e+00> : vector<32x128xf32>
    %9 = tpu.matmul %8, %6, %cst_10 {dimension_numbers = #tpu.dot_dimension_numbers<[1], [0], [0], [1], [0, 0, 1, 1], [], []>} : vector<32x32xbf16>, vector<32x128xbf16>, vector<32x128xf32> -> vector<32x128xf32>
    %10 = vector.extract_strided_slice %5 {offsets = [0, 0], sizes = [32, 128], strides = [1, 1]} : vector<128x128xf32> to vector<32x128xf32>
    %11 = arith.addf %9, %10 : vector<32x128xf32>
    %cst_11 = arith.constant 0.000000e+00 : f32
    %12 = vector.broadcast %cst_11 : f32 to vector<32x128xf32>
    %13 = arith.maximumf %11, %12 : vector<32x128xf32>
    %14 = arith.truncf %13 : vector<32x128xf32> to vector<32x128xbf16>
    %c1 = arith.constant 1 : index
    %c0_12 = arith.constant 0 : index
    %c0_13 = arith.constant 0 : index
    %15 = vector.load %arg3[%c1, %c0_12, %c0_13] : memref<4x32x32xbf16, #tpu.memory_space<vmem>>, vector<1x32x32xbf16>
    %16 = vector.shape_cast %15 : vector<1x32x32xbf16> to vector<32x32xbf16>
    %cst_14 = arith.constant dense<0.000000e+00> : vector<32x128xf32>
    %17 = tpu.matmul %16, %14, %cst_14 {dimension_numbers = #tpu.dot_dimension_numbers<[1], [0], [0], [1], [0, 0, 1, 1], [], []>} : vector<32x32xbf16>, vector<32x128xbf16>, vector<32x128xf32> -> vector<32x128xf32>
    %18 = vector.extract_strided_slice %5 {offsets = [32, 0], sizes = [32, 128], strides = [1, 1]} : vector<128x128xf32> to vector<32x128xf32>
    %19 = arith.addf %17, %18 : vector<32x128xf32>
    %cst_15 = arith.constant 0.000000e+00 : f32
    %20 = vector.broadcast %cst_15 : f32 to vector<32x128xf32>
    %21 = arith.maximumf %19, %20 : vector<32x128xf32>
    %22 = arith.truncf %21 : vector<32x128xf32> to vector<32x128xbf16>
    %c2 = arith.constant 2 : index
    %c0_16 = arith.constant 0 : index
    %c0_17 = arith.constant 0 : index
    %23 = vector.load %arg3[%c2, %c0_16, %c0_17] : memref<4x32x32xbf16, #tpu.memory_space<vmem>>, vector<1x32x32xbf16>
    %24 = vector.shape_cast %23 : vector<1x32x32xbf16> to vector<32x32xbf16>
    %cst_18 = arith.constant dense<0.000000e+00> : vector<32x128xf32>
    %25 = tpu.matmul %24, %22, %cst_18 {dimension_numbers = #tpu.dot_dimension_numbers<[1], [0], [0], [1], [0, 0, 1, 1], [], []>} : vector<32x32xbf16>, vector<32x128xbf16>, vector<32x128xf32> -> vector<32x128xf32>
    %26 = vector.extract_strided_slice %5 {offsets = [64, 0], sizes = [32, 128], strides = [1, 1]} : vector<128x128xf32> to vector<32x128xf32>
    %27 = arith.addf %25, %26 : vector<32x128xf32>
    %cst_19 = arith.constant 0.000000e+00 : f32
    %28 = vector.broadcast %cst_19 : f32 to vector<32x128xf32>
    %29 = arith.maximumf %27, %28 : vector<32x128xf32>
    %30 = arith.truncf %29 : vector<32x128xf32> to vector<32x128xbf16>
    %c3 = arith.constant 3 : index
    %c0_20 = arith.constant 0 : index
    %c0_21 = arith.constant 0 : index
    %31 = vector.load %arg3[%c3, %c0_20, %c0_21] : memref<4x32x32xbf16, #tpu.memory_space<vmem>>, vector<1x32x32xbf16>
    %32 = vector.shape_cast %31 : vector<1x32x32xbf16> to vector<32x32xbf16>
    %cst_22 = arith.constant dense<0.000000e+00> : vector<32x128xf32>
    %33 = tpu.matmul %32, %30, %cst_22 {dimension_numbers = #tpu.dot_dimension_numbers<[1], [0], [0], [1], [0, 0, 1, 1], [], []>} : vector<32x32xbf16>, vector<32x128xbf16>, vector<32x128xf32> -> vector<32x128xf32>
    %34 = vector.extract_strided_slice %5 {offsets = [96, 0], sizes = [32, 128], strides = [1, 1]} : vector<128x128xf32> to vector<32x128xf32>
    %35 = arith.addf %33, %34 : vector<32x128xf32>
    %36 = vector.extract_strided_slice %35 {offsets = [0, 0], sizes = [8, 128], strides = [1, 1]} : vector<32x128xf32> to vector<8x128xf32>
    %c0_23 = arith.constant 0 : index
    %c0_24 = arith.constant 0 : index
    %37 = vector.load %arg6[%c0_23, %c0_24] : memref<8x128xf32, #tpu.memory_space<vmem>>, vector<8x128xf32>
    tpu.vector_store %arg6[%c0_23, %c0_24], %36 {strides = array<i32>} : memref<8x128xf32, #tpu.memory_space<vmem>>, vector<8x128xf32>,
    return
  }
  func.func @transform_0(%arg0: i32) -> (i32, i32) {
    %c0_i32 = arith.constant 0 : i32
    %c0_i32_0 = arith.constant 0 : i32
    return %c0_i32, %arg0 : i32, i32
  }
  func.func @transform_1(%arg0: i32) -> (i32, i32) {
    %c0_i32 = arith.constant 0 : i32
    %c0_i32_0 = arith.constant 0 : i32
    return %c0_i32, %arg0 : i32, i32
  }
  func.func @transform_2(%arg0: i32) -> (i32, i32, i32) {
    %c0_i32 = arith.constant 0 : i32
    %c0_i32_0 = arith.constant 0 : i32
    %c0_i32_1 = arith.constant 0 : i32
    %c0_i32_2 = arith.constant 0 : i32
    return %c0_i32, %c0_i32_0, %c0_i32_1 : i32, i32, i32
  }
  func.func @transform_3(%arg0: i32) -> (i32, i32) {
    %c0_i32 = arith.constant 0 : i32
    %c0_i32_0 = arith.constant 0 : i32
    %c0_i32_1 = arith.constant 0 : i32
    return %c0_i32, %c0_i32_0 : i32, i32
  }
  func.func @transform_4(%arg0: i32) -> (i32, i32) {
    %c0_i32 = arith.constant 0 : i32
    %c0_i32_0 = arith.constant 0 : i32
    %c0_i32_1 = arith.constant 0 : i32
    return %c0_i32, %c0_i32_0 : i32, i32
  }
  func.func @transform_5(%arg0: i32) -> (i32, i32) {
    %c0_i32 = arith.constant 0 : i32
    %c0_i32_0 = arith.constant 0 : i32
    return %c0_i32, %arg0 : i32, i32
  }
}

</mosaic_0001>

<bundles_post_ra>
// kernel: point_rend_sem_seg_head_eval.2
= control target key start
LH: loop header
LB: loop body
LE: loop exit
PB: predicated region body
PF: predicated region fallthrough
CT: control target
= control target key end

     0   :  { %s1210_s18 = smov 0   ;;  %s1212_s19 = smov 0   ;;  %s1379_s0 = inlined_call_operand.vmem [shape: bf16[32,256], index: 0, kind: input, shape index: {}]   ;;  %s1380_s1 = inlined_call_operand.vmem [shape: bf16[8,256], index: 1, kind: input, shape index: {}]   ;;  %s1381_s2 = inlined_call_operand.vmem [shape: bf16[4,32,32], index: 2, kind: input, shape index: {}]   ;;  %s1382_s3 = inlined_call_operand.vmem [shape: bf16[128,8], index: 3, kind: input, shape index: {}]   ;;  %s1383_s4 = inlined_call_operand.vmem [shape: f32[128,1], index: 4, kind: input, shape index: {}]   ;;  %s1384_s5 = inlined_call_operand.vmem [shape: f32[8,256], index: 5, kind: output, shape index: {}]  }
   0x1   :  { %s1214_s20 = smov 0  }
   0x2 LB: > { %s950_s21 = sadd.s32 4294967295, %s1177_s20   ;;  %s1227_s22 = sadd.s32 1, %s1177_s20   ;;  %s1177_s20 = sphi %s1214_s20, %s1387_s20   ;;  %s1173_s19 = sphi %s1212_s19, %s1386_s19   ;;  %s1169_s18 = sphi %s1210_s18, %s1385_s18  }
   0x3   : > { %s19_s23 = ssub.s32 %s1177_s20, %s1227_s22  ;;  %s22_s24 = sadd.s32 1, %s1173_s19 }
   0x4   : > { %p20_p0 = scmp.eq.s32.totalorder %s19_s23, 0  ;;  %p29_p1 = scmp.ne.s32.totalorder %s1173_s19, %s1169_s18 }
   0x5   : > { %p30_p2 = scmp.eq.s32.totalorder %s1177_s20, 0  ;;  %p953_p4 = scmp.ge.s32.totalorder %s1177_s20, 2 }
   0x6   : > { %s1236_s25 = scalar_select %p20_p0, %s1173_s19, %s22_s24  }
   0x7   : > { %p31_p3 = por %p30_p2, %p29_p1  ;;  %179 = sbr.rel (%p953_p4) target bundleno = 21 (0x15), region = 28 }
   0xe   : > { %182 = sbr.rel (!%p31_p3) target bundleno = 21 (0x15), region = 32  ;;  %s184_s26 = sand.u32 (%p31_p3), 1, %s1173_s19  }
   0xf   : > { %s955_s27 = sshll.u32 (%p31_p3), %s1177_s20, 2  ;;  %s954_s28 = sshll.u32 (%p31_p3), %s184_s26, 4 }
  0x10   : > { %s188_s6 = scalar_lea.vmem (%p31_p3), %s1379_s0, %s955_s27  ;;  %s186_s7 = scalar_lea.vmem (%p31_p3), [#allocation2], %s954_s28 }
  0x11   : > { %v204_v0 = vld [vmem:[%s188_s6] sm:$0xf] (%p31_p3)  ;;  %v206_v1 = vld [vmem:[%s188_s6 + $0x8] sm:$0xf] (%p31_p3)  ;;  %v208_v2 = vld [vmem:[%s188_s6 + $0x10] sm:$0xf] (%p31_p3) }
  0x12   : > { %205 = vst [vmem:[%s186_s7] sm:$0xf] (%p31_p3), %v204_v0  ;;  %207 = vst [vmem:[%s186_s7 + $0x4] sm:$0xf] (%p31_p3), %v206_v1  ;;  %v210_v3 = vld [vmem:[%s188_s6 + $0x18] sm:$0xf] (%p31_p3) }
  0x13   : > { %209 = vst [vmem:[%s186_s7 + $0x8] sm:$0xf] (%p31_p3), %v208_v2  ;;  %211 = vst [vmem:[%s186_s7 + $0xc] sm:$0xf] (%p31_p3), %v210_v3 }
  0x15 PF: > { %p956_p5 = scmp.ge.s32.totalorder %s1177_s20, 1  ;;  %p248_p6 = scmp.lt.s32.totalorder %s1177_s20, 3 }
  0x17   : > { %p249_p7 = pnand %p956_p5, %p248_p6 }
  0x18   : > { %s255_s8 = sand.u32 (!%p249_p7), 1, %s1169_s18   ;;  %p285_p8 = scmp.lt.s32.totalorder (!%p249_p7), %s950_s21, 1  ;;  %v1138_v4 = vld [vmem:[%s1382_s3] sm:$0xff] (!%p249_p7)   ;;  %vm444_vm0 = vcmask (!%p249_p7), 64512   ;;  %vm469_vm1 = vcmask (!%p249_p7), 1043456   ;;  %vm597_vm2 = vcmask (!%p249_p7), 261120  }
  0x19   : > { %252 = sbr.rel (%p249_p7) target bundleno = 945 (0x3b1), region = 77  ;;  %s957_s11 = sshll.u32 (!%p249_p7), %s255_s8, 4  ;;  %1035 = vmatprep.mubr.msk.bf16.mxu1 (!%p249_p7), %vm444_vm0, %v1138_v4  ;;  %v1141_v7 = vld [vmem:[%s1381_s2] sm:$0xff] (!%p249_p7)   ;;  %v1140_v9 = vld [vmem:[%s1382_s3 + $0x8] sm:$0xff] (!%p249_p7)   ;;  %v1179_v12 = vmov (!%p249_p7), 0   ;;  %v1143_v13 = vld [vmem:[%s1382_s3 + $0x10] sm:$0xff] (!%p249_p7)  }
  0x1a   : > { %s257_s12 = scalar_lea.vmem (!%p249_p7), [#allocation2], %s957_s11  ;;  %1055 = vmatprep.mubr.msk.bf16.mxu0 (!%p249_p7), %vm597_vm2, %v1141_v7  ;;  %v1142_v11 = vld [vmem:[%s1381_s2 + $0x8] sm:$0xff] (!%p249_p7)   ;;  %1135 = vset.pattern.permute.xlu0 (!%p249_p7), %v1179_v12  ;;  %v311_v14 = vld [vmem:[%s1383_s4] sm:$0xff] (!%p249_p7)  ;;  %v313_v15 = vld [vmem:[%s1383_s4 + $0x10] sm:$0xff] (!%p249_p7) }
  0x1b   : > { %v1137_v5 = vld [vmem:[%s257_s12] sm:$0xff] (!%p249_p7)   ;;  %v1139_v6 = vld [vmem:[%s257_s12 + $0x8] sm:$0xff] (!%p249_p7)   ;;  %1136 = vset.pattern.permute.xlu1 (!%p249_p7), %v1179_v12  ;;  %329 = vperm.xlu0 (!%p249_p7), %1135, %v311_v14  }
  0x1c   : > { %1051 = vmatprep.subr.bf16.mxu0 (!%p249_p7), %v1137_v5  ;;  %339 = vperm.xlu1 (!%p249_p7), %1136, %v313_v15   ;;  %v312_v16 = vld [vmem:[%s1383_s4 + $0x8] sm:$0xff] (!%p249_p7)  ;;  %v314_v17 = vld [vmem:[%s1383_s4 + $0x18] sm:$0xff] (!%p249_p7)  ;;  %v1145_v19 = vld [vmem:[%s1382_s3 + $0x20] sm:$0xff] (!%p249_p7)  }
  0x1d   : > { %1052 = vmatpush3.bf16.msra.mxu0 (!%p249_p7), %v1137_v5  ;;  %v1144_v18 = vld [vmem:[%s1382_s3 + $0x18] sm:$0xff] (!%p249_p7)   ;;  %v315_v20 = vld [vmem:[%s1383_s4 + $0x20] sm:$0xff] (!%p249_p7)  ;;  %v316_v21 = vld [vmem:[%s1383_s4 + $0x28] sm:$0xff] (!%p249_p7) }
  0x1e   : > { %1053 = vmatprep.subr.bf16.mxu0 (!%p249_p7), %v1139_v6  ;;  %v317_v22 = vld [vmem:[%s1383_s4 + $0x30] sm:$0xff] (!%p249_p7)  ;;  %v318_v23 = vld [vmem:[%s1383_s4 + $0x38] sm:$0xff] (!%p249_p7)  ;;  %v1146_v24 = vld [vmem:[%s1382_s3 + $0x28] sm:$0xff] (!%p249_p7)  }
  0x1f   : > { %334 = vperm.xlu0 (!%p249_p7), %1135, %v312_v16   ;;  %v1147_v25 = vld [vmem:[%s1382_s3 + $0x30] sm:$0xff] (!%p249_p7)   ;;  %v319_v26 = vld [vmem:[%s1383_s4 + $0x40] sm:$0xff] (!%p249_p7)  ;;  %v320_v27 = vld [vmem:[%s1383_s4 + $0x48] sm:$0xff] (!%p249_p7) }
  0x20   : > { %s1389_s21 = smov (!%p285_p8, %s950_s21), 1  ;;  %344 = vperm.xlu1 %1136, %v314_v17   ;;  %v321_v28 = vld [vmem:[%s1383_s4 + $0x50] sm:$0xff]  ;;  %v322_v29 = vld [vmem:[%s1383_s4 + $0x58] sm:$0xff]  ;;  %v323_v31 = vld [vmem:[%s1383_s4 + $0x60] sm:$0xff] }
  0x21   : > { %s958_s13 = sshll.u32 %s1389_s21, 2  ;;  %1054 = vmatpush3.bf16.msra.mxu0 %v1139_v6  ;;  %v1148_v30 = vld [vmem:[%s1382_s3 + $0x38] sm:$0xff]   ;;  %v1149_v32 = vld [vmem:[%s1381_s2 + $0x10] sm:$0xff]   ;;  %s959_s10 = sshll.u32 %s1389_s21, 3 }
  0x22   : > { %s288_s18 = scalar_lea.vmem %s1380_s1, %s958_s13  ;;  %v1150_v0 = vld [vmem:[%s1381_s2 + $0x18] sm:$0xff]   ;;  %s292_s13 = scalar_lea.vmem %s1384_s5, %s959_s10 }
  0x23   : > { %v294_v8 = vld [vmem:[%s288_s18] sm:$0xf]  ;;  %349 = vperm.xlu0 %1135, %v315_v20  }
  0x24   : > { %1109 = vmatprep.subr.msk.bf16.mxu1 %vm469_vm1, %v294_v8  ;;  %v471_v10 = vsel %vm469_vm1, %v294_v8, 0  ;;  %1056 = vmatmul.mubr.msk.bf16.vlgmr.msra.gmra.mrb[0].mxu0 %vm597_vm2, %v1142_v11  ;;  %v1151_v8 = vld [vmem:[%s1381_s2 + $0x20] sm:$0xff]  }
  0x25   : > { %1034 = vmatpush3.bf16.msra.mxu1 %v471_v10  ;;  %354 = vperm.xlu1 %1136, %v316_v21  }
  0x26   : > { %1063 = vmatprep.mubr.msk.bf16.mxu0 %vm597_vm2, %v1149_v32  ;;  %v1153_v32 = vld [vmem:[%s1381_s2 + $0x30] sm:$0xff]  }
  0x27   : > { %359 = vperm.xlu0 %1135, %v317_v22  }
  0x28   : > { %1036 = vmatmul.mubr.msk.bf16.vlgmr.msra.gmra.mrb[0].mxu1 %vm444_vm0, %v1140_v9 }
  0x29   : > { %1039 = vmatprep.mubr.msk.bf16.mxu1 %vm444_vm0, %v1143_v13  ;;  %364 = vperm.xlu1 %1136, %v318_v23  }
  0x2b   : > { %369 = vperm.xlu0 %1135, %v319_v26  }
  0x2d   : > { %374 = vperm.xlu1 %1136, %v320_v27  }
  0x2f   : > { %379 = vperm.xlu0 %1135, %v321_v28  }
  0x30   : > { %1040 = vmatmul.mubr.msk.bf16.gmra.mrb[4].mxu1 %vm444_vm0, %v1144_v18 }
  0x31   : > { %1043 = vmatprep.mubr.msk.bf16.mxu1 %vm444_vm0, %v1145_v19  ;;  %384 = vperm.xlu1 %1136, %v322_v29  }
  0x33   : > { %389 = vperm.xlu0 %1135, %v323_v31   ;;  %v1152_v31 = vld [vmem:[%s1381_s2 + $0x28] sm:$0xff]  }
  0x38   : > { %1044 = vmatmul.mubr.msk.bf16.gmra.mrb[8].mxu1 %vm444_vm0, %v1146_v24 }
  0x39   : > { %1047 = vmatprep.mubr.msk.bf16.mxu1 %vm444_vm0, %v1147_v25 }
  0x40   : > { %1048 = vmatmul.mubr.msk.bf16.gmra.mrb[12].mxu1 %vm444_vm0, %v1148_v30 }
  0x9a   : > { %v330_v33 = vpop.permute.xlu0 %329 }
  0x9b   : > { %v340_v34 = vpop.permute.xlu1 %339 }
  0x9e   : > { %v335_v35 = vpop.permute.xlu0 %334 }
  0x9f   : > { %v345_v36 = vpop.permute.xlu1 %344 }
  0xa2   : > { %v350_v9 = vpop.permute.xlu0 %349 }
  0xa4   : > { %v355_v10 = vpop.permute.xlu1 %354 }
  0xa6   : > { %v360_v11 = vpop.permute.xlu0 %359 }
  0xa8   : > { %v365_v13 = vpop.permute.xlu1 %364 }
  0xf7   : > { %v1057_v40 = vpop.f32.mrb[0].mxu0 }
  0xf8   : > { %v638_v43 = vpop.f32.mrb[1].mxu0 }
  0xf9   : > { %v1058_v47 = vpop.f32.mrb[2].mxu0 }
  0xfa   : > { %v641_v50 = vpop.f32.mrb[3].mxu0 }
  0xfb   : > { %v1037_v37 = vpop.f32.mrb[0].mxu1 }
  0xfc   : > { %v516_v38 = vadd.f32 %v1037_v37, %v340_v34  ;;  %v507_v39 = vpop.f32.mrb[1].mxu1  ;;  %v375_v34 = vpop.permute.xlu1 %374 }
  0xfd   : > { %v508_v41 = vadd.f32 %v507_v39, %v330_v33  ;;  %v1038_v42 = vpop.f32.mrb[2].mxu1  ;;  %v370_v33 = vpop.permute.xlu0 %369 }
  0xfe   : > { %v519_v44 = vadd.f32 %v1038_v42, %v345_v36  ;;  %v510_v45 = vpop.f32.mrb[3].mxu1  ;;  %v647_v46 = vadd.f32 %v1057_v40, %v516_v38 }
  0xff   : > { %v511_v48 = vadd.f32 %v510_v45, %v335_v35  ;;  %v639_v49 = vadd.f32 %v638_v43, %v508_v41 }
 0x100   : > { %v650_v51 = vadd.f32 %v1058_v47, %v519_v44  ;;  %v655_v53 = vmax.f32 %v647_v46, 0.0  ;;  %v385_v37 = vpop.permute.xlu1 %384 }
 0x101   : > { %v642_v52 = vadd.f32 %v641_v50, %v511_v48  ;;  %v653_v55 = vmax.f32 %v639_v49, 0.0  ;;  %v380_v35 = vpop.permute.xlu0 %379 }
 0x102   : > { %v656_v54 = vmax.f32 %v650_v51, 0.0 }
 0x103   : > { %v654_v56 = vmax.f32 %v642_v52, 0.0  ;;  %v1041_v57 = vpop.f32.mrb[4].mxu1 }
 0x104   : > { %v658_v58 = vpack.c.bf16 %v656_v54, %v655_v53  ;;  %v523_v59 = vpop.f32.mrb[5].mxu1  ;;  %v532_v12 = vadd.f32 %v1041_v57, %v360_v11 }
 0x105   : > { %v657_v60 = vpack.c.bf16 %v654_v56, %v653_v55  ;;  %v1042_v61 = vpop.f32.mrb[6].mxu1  ;;  %v524_v14 = vadd.f32 %v523_v59, %v350_v9  ;;  %v1154_v55 = vld [vmem:[%s1381_s2 + $0x38] sm:$0xff]   ;;  %v390_v56 = vpop.permute.xlu0 %389 }
 0x106   : > { %v526_v62 = vpop.f32.mrb[7].mxu1  ;;  %v535_v16 = vadd.f32 %v1042_v61, %v365_v13 }
 0x107   : > { %1059 = vmatprep.subr.bf16.mxu0 %v657_v60  ;;  %v527_v19 = vadd.f32 %v526_v62, %v355_v10 }
 0x108   : > { %1060 = vmatpush3.bf16.msra.mxu0 %v657_v60 }
 0x109   : > { %1061 = vmatprep.subr.bf16.mxu0 %v658_v58 }
 0x10b   : > { %v1045_v63 = vpop.f32.mrb[8].mxu1 }
 0x10c   : > { %v539_v1 = vpop.f32.mrb[9].mxu1  ;;  %1062 = vmatpush3.bf16.msra.mxu0 %v658_v58  ;;  %v548_v36 = vadd.f32 %v1045_v63, %v380_v35 }
 0x10d   : > { %v1046_v2 = vpop.f32.mrb[10].mxu1  ;;  %v540_v38 = vadd.f32 %v539_v1, %v370_v33 }
 0x10e   : > { %v542_v3 = vpop.f32.mrb[11].mxu1  ;;  %v551_v40 = vadd.f32 %v1046_v2, %v385_v37 }
 0x10f   : > { %1064 = vmatmul.mubr.msk.bf16.vlgmr.msra.gmra.mrb[4].mxu0 %vm597_vm2, %v1150_v0  ;;  %v543_v43 = vadd.f32 %v542_v3, %v375_v34 }
 0x110   : > { %1071 = vmatprep.mubr.msk.bf16.mxu0 %vm597_vm2, %v1151_v8 }
 0x113   : > { %v1049_v4 = vpop.f32.mrb[12].mxu1 }
 0x114   : > { %v1346_v5 = vpop.f32.mrb[13].mxu1 }
 0x115   : > { %v1050_v6 = vpop.f32.mrb[14].mxu1  ;;  %v556_v57 = vadd.f32 %v1346_v5, %v390_v56 }
 0x116   : > { %v558_v7 = vpop.f32.mrb[15].mxu1 }
 0x1e2   : > { %v1065_v15 = vpop.f32.mrb[4].mxu0 }
 0x1e3   : > { %v723_v17 = vadd.f32 %v1065_v15, %v532_v12  ;;  %v714_v18 = vpop.f32.mrb[5].mxu0 }
 0x1e4   : > { %v715_v20 = vadd.f32 %v714_v18, %v524_v14  ;;  %v1066_v21 = vpop.f32.mrb[6].mxu0 }
 0x1e5   : > { %v726_v22 = vadd.f32 %v1066_v21, %v535_v16  ;;  %v717_v23 = vpop.f32.mrb[7].mxu0  ;;  %v731_v25 = vmax.f32 %v723_v17, 0.0 }
 0x1e6   : > { %v718_v24 = vadd.f32 %v717_v23, %v527_v19  ;;  %v729_v27 = vmax.f32 %v715_v20, 0.0 }
 0x1e7   : > { %v732_v26 = vmax.f32 %v726_v22, 0.0 }
 0x1e8   : > { %v730_v28 = vmax.f32 %v718_v24, 0.0 }
 0x1e9   : > { %v734_v29 = vpack.c.bf16 %v732_v26, %v731_v25 }
 0x1ea   : > { %v733_v30 = vpack.c.bf16 %v730_v28, %v729_v27 }
 0x1ec   : > { %1067 = vmatprep.subr.bf16.mxu0 %v733_v30 }
 0x1ed   : > { %1068 = vmatpush3.bf16.msra.mxu0 %v733_v30 }
 0x1ee   : > { %1069 = vmatprep.subr.bf16.mxu0 %v734_v29 }
 0x1f1   : > { %1070 = vmatpush3.bf16.msra.mxu0 %v734_v29 }
 0x1f4   : > { %1072 = vmatmul.mubr.msk.bf16.vlgmr.msra.gmra.mrb[8].mxu0 %vm597_vm2, %v1152_v31 }
 0x1f5   : > { %1079 = vmatprep.mubr.msk.bf16.mxu0 %vm597_vm2, %v1153_v32 }
 0x2c7   : > { %v1073_v39 = vpop.f32.mrb[8].mxu0 }
 0x2c8   : > { %v799_v41 = vadd.f32 %v1073_v39, %v548_v36  ;;  %v790_v42 = vpop.f32.mrb[9].mxu0 }
 0x2c9   : > { %v791_v44 = vadd.f32 %v790_v42, %v540_v38  ;;  %v1074_v45 = vpop.f32.mrb[10].mxu0 }
 0x2ca   : > { %v802_v46 = vadd.f32 %v1074_v45, %v551_v40  ;;  %v793_v47 = vpop.f32.mrb[11].mxu0  ;;  %v807_v49 = vmax.f32 %v799_v41, 0.0 }
 0x2cb   : > { %v794_v48 = vadd.f32 %v793_v47, %v543_v43  ;;  %v805_v51 = vmax.f32 %v791_v44, 0.0 }
 0x2cc   : > { %v808_v50 = vmax.f32 %v802_v46, 0.0 }
 0x2cd   : > { %v806_v52 = vmax.f32 %v794_v48, 0.0 }
 0x2ce   : > { %v810_v53 = vpack.c.bf16 %v808_v50, %v807_v49 }
 0x2cf   : > { %v809_v54 = vpack.c.bf16 %v806_v52, %v805_v51 }
 0x2d1   : > { %1075 = vmatprep.subr.bf16.mxu0 %v809_v54 }
 0x2d2   : > { %1076 = vmatpush3.bf16.msra.mxu0 %v809_v54 }
 0x2d3   : > { %1077 = vmatprep.subr.bf16.mxu0 %v810_v53 }
 0x2d6   : > { %1078 = vmatpush3.bf16.msra.mxu0 %v810_v53 }
 0x2d9   : > { %1080 = vmatmul.mubr.msk.bf16.vlgmr.msra.gmra.mrb[12].mxu0 %vm597_vm2, %v1154_v55 }
 0x3ac   : > { %v1081_v58 = vpop.f32.mrb[12].mxu0 }
 0x3ad   : > { %v866_v59 = vpop.f32.mrb[13].mxu0 }
 0x3ae   : > { %v867_v60 = vadd.f32 %v866_v59, %v556_v57  ;;  %v1082_v61 = vpop.f32.mrb[14].mxu0 }
 0x3af   : > { %v869_v62 = vpop.f32.mrb[15].mxu0 }
 0x3b0   : > { %878 = vst [vmem:[%s292_s13] sm:$0xff] %v867_v60 }
 0x3b1 PF: > { %p12_p9 = scmp.ge.s32.totalorder %s1227_s22, 4   ;;  %s1385_s18 = smov %s1173_s19 }
 0x3b2   : > { %s1386_s19 = smov %s1236_s25  ;;  %s1387_s20 = smov %s1227_s22 }
 0x3b3   :  { %14 = sbr.rel (!%p12_p9) target bundleno = 2 (0x2), region = 122 }

</bundles_post_ra>
